<compile_context>
chip_gen: v6e
topology: v6e:2x2x1
jax: 0.10.0
libtpu: 0.0.40
codegen_flags: <defaults>
</compile_context>

<pallas_src>
import functools

import jax
import jax.numpy as jnp
import numpy as np
from jax import lax
from jax.experimental import pallas as pl
from jax.experimental.pallas import tpu as pltpu


def _attention_kernel(x_ref, wkvT_ref, bkv_ref, o_ref, *,
                      emb_size, num_heads, head_dim, scaling):
    # x_ref:    (1, N, E)   — one batch element
    # wkvT_ref: (E, 2E)     — [W_k.T | W_v.T]; keys/values fused in one matmul
    # bkv_ref:  (1, 2E)     — [b_k   | b_v  ]
    # o_ref:    (1, N, E)   — lane-dense output; head h occupies cols [h*D,(h+1)*D)
    x = x_ref[0]  # (N, E), keep input dtype; MXU accumulates in f32

    kv = jnp.dot(x, wkvT_ref[...], preferred_element_type=jnp.float32)
    kv = kv + bkv_ref[...].astype(jnp.float32)       # (N, 2E) f32
    keys = kv[:, :emb_size]                           # (N, E)
    values = kv[:, emb_size:]                         # (N, E)

    outs = []
    for h in range(num_heads):             # small H -> straight-line code
        lo = h * head_dim
        k_h = keys[:, lo:lo + head_dim]    # (N, D)
        v_h = values[:, lo:lo + head_dim]  # (N, D)

        # dotprod = k_h @ k_h^T without materializing an explicit transpose.
        dot = lax.dot_general(k_h, k_h,
                              dimension_numbers=(((1,), (1,)), ((), ())),
                              preferred_element_type=jnp.float32)    # (N, N)

        # Numerically stable softmax; fold /sqrt(emb_size) and the softmax
        # denominator into a single per-row EUP reciprocal.
        m = jnp.max(dot, axis=-1, keepdims=True)
        e = jnp.exp(dot - m)
        denom = jnp.sum(e, axis=-1, keepdims=True)
        inv = pl.reciprocal(denom * scaling, approx=True)            # (N, 1)
        att = e * inv                      # dropout p=0 -> identity (self.att_drop)

        outs.append(jnp.dot(att, v_h, preferred_element_type=jnp.float32))  # (N, D)

    # TODO(synk): for large N, tile the KV axis with online softmax (flash-style)
    # so the (N, N) score tile stays bounded in VMEM (v7x has only 64 MiB / TC).
    o_ref[0] = jnp.concatenate(outs, axis=-1).astype(o_ref.dtype)    # one lane-dense store


def budget_attention_two(x, wk, bk, wv, bv, *, emb_size, num_heads):
    """x: (B, N, E). wk/wv: (E, E) in PyTorch (out, in) layout. bk/bv: (E,)."""
    B, N, E = x.shape
    assert E == emb_size
    assert E % num_heads == 0
    D = E // num_heads
    scaling = float(emb_size) ** 0.5

    # PyTorch Linear: y = x @ W.T + b.  Fuse K and V projections into one
    # (E, 2E) weight so the kernel issues a single MXU weight push per batch step.
    wkvT = jnp.concatenate([wk.T, wv.T], axis=1)      # (E, 2E)
    bkv = jnp.concatenate([bk, bv], axis=0).reshape(1, 2 * E)

    kernel = functools.partial(_attention_kernel,
                               emb_size=E, num_heads=num_heads,
                               head_dim=D, scaling=scaling)

    out = pl.pallas_call(
        kernel,
        out_shape=jax.ShapeDtypeStruct((B, N, E), x.dtype),
        grid_spec=pltpu.PrefetchScalarGridSpec(
            num_scalar_prefetch=0,
            grid=(B,),
            in_specs=[
                pl.BlockSpec((1, N, E), lambda b: (b, 0, 0)),       # x (one batch elem)
                pl.BlockSpec((E, 2 * E), lambda b: (0, 0)),         # [W_k.T | W_v.T]
                pl.BlockSpec((1, 2 * E), lambda b: (0, 0)),         # [b_k   | b_v  ]
            ],
            out_specs=pl.BlockSpec((1, N, E), lambda b: (b, 0, 0)),
        ),
        compiler_params=pltpu.CompilerParams(
            dimension_semantics=("parallel",)),       # batch shards across v7x TCs
    )(x, wkvT, bkv)
    return out


def _reference(x, wk, bk, wv, bv, *, emb_size, num_heads):
    B, N, E = x.shape
    H = num_heads
    D = E // H
    keys = (x @ wk.T + bk).reshape(B, N, H, D).transpose(0, 2, 1, 3)    # (B,H,N,D)
    values = (x @ wv.T + bv).reshape(B, N, H, D).transpose(0, 2, 1, 3)  # (B,H,N,D)
    dotprod = jnp.einsum('bhnd,bhmd->bhnm', keys, keys)
    att = jax.nn.softmax(dotprod, axis=-1) / (emb_size ** 0.5)
    out = jnp.einsum('bhal,bhlv->bhav', att, values)
    return out.transpose(0, 2, 1, 3).reshape(B, N, E)


if __name__ == "__main__":
    emb_size = 32
    num_heads = 4
    B, N = 2, 8

    key = jax.random.PRNGKey(0)
    k_x, k_wk, k_bk, k_wv, k_bv = jax.random.split(key, 5)

    # Deterministic parameter init (PyTorch-Linear-like uniform bounds).
    bound = 1.0 / np.sqrt(emb_size)
    x = jax.random.normal(k_x, (B, N, emb_size), dtype=jnp.float32)
    wk = jax.random.uniform(k_wk, (emb_size, emb_size), jnp.float32, -bound, bound)
    bk = jax.random.uniform(k_bk, (emb_size,), jnp.float32, -bound, bound)
    wv = jax.random.uniform(k_wv, (emb_size, emb_size), jnp.float32, -bound, bound)
    bv = jax.random.uniform(k_bv, (emb_size,), jnp.float32, -bound, bound)

    out = budget_attention_two(x, wk, bk, wv, bv,
                               emb_size=emb_size, num_heads=num_heads)
    out = jax.block_until_ready(out)

    ref = _reference(x, wk, bk, wv, bv, emb_size=emb_size, num_heads=num_heads)
    # Tolerance loosened slightly vs 1e-5 because the softmax denominator uses
    # the EUP approximate reciprocal (pl.reciprocal(..., approx=True)).
    np.testing.assert_allclose(np.asarray(out), np.asarray(ref), rtol=1e-3, atol=1e-3)

    print("KERNEL_OK")
</pallas_src>

<mosaic_0001>
module attributes {stable_mosaic.version = 11 : i64} {
  func.func @_attention_kernel(%arg0: i32, %arg1: memref<1x8x32xf32, #tpu.memory_space<vmem>>, %arg2: memref<32x64xf32, #tpu.memory_space<vmem>>, %arg3: memref<1x64xf32, #tpu.memory_space<vmem>>, %arg4: memref<1x8x32xf32, #tpu.memory_space<vmem>>) attributes {dimension_semantics = [#tpu.dimension_semantics<parallel>], iteration_bounds = array<i64: 2>, scalar_prefetch = 0 : i64, scratch_operands = 0 : i64, tpu.core_type = #tpu.core_type<tc>, window_params = [{transform_indices = @transform_0, window_bounds = array<i64: 1, 8, 32>}, {pipeline_mode = #tpu.pipeline_mode<synchronous>, transform_indices = @transform_1, window_bounds = array<i64: 32, 64>}, {pipeline_mode = #tpu.pipeline_mode<synchronous>, transform_indices = @transform_2, window_bounds = array<i64: 1, 64>}, {transform_indices = @transform_3, window_bounds = array<i64: 1, 8, 32>}]} {
    %c0 = arith.constant 0 : index
    %c0_0 = arith.constant 0 : index
    %c0_1 = arith.constant 0 : index
    %0 = vector.load %arg1[%c0, %c0_0, %c0_1] : memref<1x8x32xf32, #tpu.memory_space<vmem>>, vector<1x8x32xf32>
    %1 = vector.shape_cast %0 : vector<1x8x32xf32> to vector<8x32xf32>
    %c0_2 = arith.constant 0 : index
    %c0_3 = arith.constant 0 : index
    %2 = vector.load %arg2[%c0_2, %c0_3] : memref<32x64xf32, #tpu.memory_space<vmem>>, vector<32x64xf32>
    %cst = arith.constant dense<0.000000e+00> : vector<8x64xf32>
    %3 = tpu.matmul %1, %2, %cst {dimension_numbers = #tpu.dot_dimension_numbers<[1], [0], [0], [1], [0, 0, 1, 1], [], []>} : vector<8x32xf32>, vector<32x64xf32>, vector<8x64xf32> -> vector<8x64xf32>
    %c0_4 = arith.constant 0 : index
    %c0_5 = arith.constant 0 : index
    %4 = vector.load %arg3[%c0_4, %c0_5] : memref<1x64xf32, #tpu.memory_space<vmem>>, vector<1x64xf32>
    %5 = vector.broadcast %4 : vector<1x64xf32> to vector<8x64xf32>
    %6 = arith.addf %3, %5 : vector<8x64xf32>
    %7 = vector.extract_strided_slice %6 {offsets = [0, 0], sizes = [8, 32], strides = [1, 1]} : vector<8x64xf32> to vector<8x32xf32>
    %8 = vector.extract_strided_slice %6 {offsets = [0, 32], sizes = [8, 32], strides = [1, 1]} : vector<8x64xf32> to vector<8x32xf32>
    %9 = vector.extract_strided_slice %7 {offsets = [0, 0], sizes = [8, 8], strides = [1, 1]} : vector<8x32xf32> to vector<8x8xf32>
    %10 = vector.extract_strided_slice %8 {offsets = [0, 0], sizes = [8, 8], strides = [1, 1]} : vector<8x32xf32> to vector<8x8xf32>
    %cst_6 = arith.constant dense<0.000000e+00> : vector<8x8xf32>
    %11 = tpu.matmul %9, %9, %cst_6 {dimension_numbers = #tpu.dot_dimension_numbers<[1], [1], [0], [0], [0, 0, 1, 0], [], []>} : vector<8x8xf32>, vector<8x8xf32>, vector<8x8xf32> -> vector<8x8xf32>
    %cst_7 = arith.constant dense<0xFF800000> : vector<8xf32>
    %12 = vector.multi_reduction <maximumf>, %11, %cst_7 [1] : vector<8x8xf32> to vector<8xf32>
    %13 = vector.shape_cast %12 : vector<8xf32> to vector<8x1xf32>
    %14 = vector.broadcast %13 : vector<8x1xf32> to vector<8x8xf32>
    %15 = arith.subf %11, %14 : vector<8x8xf32>
    %16 = math.exp %15 : vector<8x8xf32>
    %cst_8 = arith.constant dense<0.000000e+00> : vector<8xf32>
    %17 = vector.multi_reduction <add>, %16, %cst_8 [1] : vector<8x8xf32> to vector<8xf32>
    %18 = vector.shape_cast %17 : vector<8xf32> to vector<8x1xf32>
    %cst_9 = arith.constant 5.65685415 : f32
    %19 = vector.broadcast %cst_9 : f32 to vector<8x1xf32>
    %20 = arith.mulf %18, %19 : vector<8x1xf32>
    %21 = tpu.reciprocal %20 {approx = true} : vector<8x1xf32> -> vector<8x1xf32>
    %22 = vector.broadcast %21 : vector<8x1xf32> to vector<8x8xf32>
    %23 = arith.mulf %16, %22 : vector<8x8xf32>
    %cst_10 = arith.constant dense<0.000000e+00> : vector<8x8xf32>
    %24 = tpu.matmul %23, %10, %cst_10 {dimension_numbers = #tpu.dot_dimension_numbers<[1], [0], [0], [1], [0, 0, 1, 1], [], []>} : vector<8x8xf32>, vector<8x8xf32>, vector<8x8xf32> -> vector<8x8xf32>
    %25 = vector.extract_strided_slice %7 {offsets = [0, 8], sizes = [8, 8], strides = [1, 1]} : vector<8x32xf32> to vector<8x8xf32>
    %26 = vector.extract_strided_slice %8 {offsets = [0, 8], sizes = [8, 8], strides = [1, 1]} : vector<8x32xf32> to vector<8x8xf32>
    %cst_11 = arith.constant dense<0.000000e+00> : vector<8x8xf32>
    %27 = tpu.matmul %25, %25, %cst_11 {dimension_numbers = #tpu.dot_dimension_numbers<[1], [1], [0], [0], [0, 0, 1, 0], [], []>} : vector<8x8xf32>, vector<8x8xf32>, vector<8x8xf32> -> vector<8x8xf32>
    %cst_12 = arith.constant dense<0xFF800000> : vector<8xf32>
    %28 = vector.multi_reduction <maximumf>, %27, %cst_12 [1] : vector<8x8xf32> to vector<8xf32>
    %29 = vector.shape_cast %28 : vector<8xf32> to vector<8x1xf32>
    %30 = vector.broadcast %29 : vector<8x1xf32> to vector<8x8xf32>
    %31 = arith.subf %27, %30 : vector<8x8xf32>
    %32 = math.exp %31 : vector<8x8xf32>
    %cst_13 = arith.constant dense<0.000000e+00> : vector<8xf32>
    %33 = vector.multi_reduction <add>, %32, %cst_13 [1] : vector<8x8xf32> to vector<8xf32>
    %34 = vector.shape_cast %33 : vector<8xf32> to vector<8x1xf32>
    %cst_14 = arith.constant 5.65685415 : f32
    %35 = vector.broadcast %cst_14 : f32 to vector<8x1xf32>
    %36 = arith.mulf %34, %35 : vector<8x1xf32>
    %37 = tpu.reciprocal %36 {approx = true} : vector<8x1xf32> -> vector<8x1xf32>
    %38 = vector.broadcast %37 : vector<8x1xf32> to vector<8x8xf32>
    %39 = arith.mulf %32, %38 : vector<8x8xf32>
    %cst_15 = arith.constant dense<0.000000e+00> : vector<8x8xf32>
    %40 = tpu.matmul %39, %26, %cst_15 {dimension_numbers = #tpu.dot_dimension_numbers<[1], [0], [0], [1], [0, 0, 1, 1], [], []>} : vector<8x8xf32>, vector<8x8xf32>, vector<8x8xf32> -> vector<8x8xf32>
    %41 = vector.extract_strided_slice %7 {offsets = [0, 16], sizes = [8, 8], strides = [1, 1]} : vector<8x32xf32> to vector<8x8xf32>
    %42 = vector.extract_strided_slice %8 {offsets = [0, 16], sizes = [8, 8], strides = [1, 1]} : vector<8x32xf32> to vector<8x8xf32>
    %cst_16 = arith.constant dense<0.000000e+00> : vector<8x8xf32>
    %43 = tpu.matmul %41, %41, %cst_16 {dimension_numbers = #tpu.dot_dimension_numbers<[1], [1], [0], [0], [0, 0, 1, 0], [], []>} : vector<8x8xf32>, vector<8x8xf32>, vector<8x8xf32> -> vector<8x8xf32>
    %cst_17 = arith.constant dense<0xFF800000> : vector<8xf32>
    %44 = vector.multi_reduction <maximumf>, %43, %cst_17 [1] : vector<8x8xf32> to vector<8xf32>
    %45 = vector.shape_cast %44 : vector<8xf32> to vector<8x1xf32>
    %46 = vector.broadcast %45 : vector<8x1xf32> to vector<8x8xf32>
    %47 = arith.subf %43, %46 : vector<8x8xf32>
    %48 = math.exp %47 : vector<8x8xf32>
    %cst_18 = arith.constant dense<0.000000e+00> : vector<8xf32>
    %49 = vector.multi_reduction <add>, %48, %cst_18 [1] : vector<8x8xf32> to vector<8xf32>
    %50 = vector.shape_cast %49 : vector<8xf32> to vector<8x1xf32>
    %cst_19 = arith.constant 5.65685415 : f32
    %51 = vector.broadcast %cst_19 : f32 to vector<8x1xf32>
    %52 = arith.mulf %50, %51 : vector<8x1xf32>
    %53 = tpu.reciprocal %52 {approx = true} : vector<8x1xf32> -> vector<8x1xf32>
    %54 = vector.broadcast %53 : vector<8x1xf32> to vector<8x8xf32>
    %55 = arith.mulf %48, %54 : vector<8x8xf32>
    %cst_20 = arith.constant dense<0.000000e+00> : vector<8x8xf32>
    %56 = tpu.matmul %55, %42, %cst_20 {dimension_numbers = #tpu.dot_dimension_numbers<[1], [0], [0], [1], [0, 0, 1, 1], [], []>} : vector<8x8xf32>, vector<8x8xf32>, vector<8x8xf32> -> vector<8x8xf32>
    %57 = vector.extract_strided_slice %7 {offsets = [0, 24], sizes = [8, 8], strides = [1, 1]} : vector<8x32xf32> to vector<8x8xf32>
    %58 = vector.extract_strided_slice %8 {offsets = [0, 24], sizes = [8, 8], strides = [1, 1]} : vector<8x32xf32> to vector<8x8xf32>
    %cst_21 = arith.constant dense<0.000000e+00> : vector<8x8xf32>
    %59 = tpu.matmul %57, %57, %cst_21 {dimension_numbers = #tpu.dot_dimension_numbers<[1], [1], [0], [0], [0, 0, 1, 0], [], []>} : vector<8x8xf32>, vector<8x8xf32>, vector<8x8xf32> -> vector<8x8xf32>
    %cst_22 = arith.constant dense<0xFF800000> : vector<8xf32>
    %60 = vector.multi_reduction <maximumf>, %59, %cst_22 [1] : vector<8x8xf32> to vector<8xf32>
    %61 = vector.shape_cast %60 : vector<8xf32> to vector<8x1xf32>
    %62 = vector.broadcast %61 : vector<8x1xf32> to vector<8x8xf32>
    %63 = arith.subf %59, %62 : vector<8x8xf32>
    %64 = math.exp %63 : vector<8x8xf32>
    %cst_23 = arith.constant dense<0.000000e+00> : vector<8xf32>
    %65 = vector.multi_reduction <add>, %64, %cst_23 [1] : vector<8x8xf32> to vector<8xf32>
    %66 = vector.shape_cast %65 : vector<8xf32> to vector<8x1xf32>
    %cst_24 = arith.constant 5.65685415 : f32
    %67 = vector.broadcast %cst_24 : f32 to vector<8x1xf32>
    %68 = arith.mulf %66, %67 : vector<8x1xf32>
    %69 = tpu.reciprocal %68 {approx = true} : vector<8x1xf32> -> vector<8x1xf32>
    %70 = vector.broadcast %69 : vector<8x1xf32> to vector<8x8xf32>
    %71 = arith.mulf %64, %70 : vector<8x8xf32>
    %cst_25 = arith.constant dense<0.000000e+00> : vector<8x8xf32>
    %72 = tpu.matmul %71, %58, %cst_25 {dimension_numbers = #tpu.dot_dimension_numbers<[1], [0], [0], [1], [0, 0, 1, 1], [], []>} : vector<8x8xf32>, vector<8x8xf32>, vector<8x8xf32> -> vector<8x8xf32>
    %73 = tpu.concatenate %24, %40, %56, %72 in 1 : vector<8x8xf32>, vector<8x8xf32>, vector<8x8xf32>, vector<8x8xf32> -> vector<8x32xf32>
    %c0_26 = arith.constant 0 : index
    %c0_27 = arith.constant 0 : index
    %c0_28 = arith.constant 0 : index
    %74 = vector.load %arg4[%c0_26, %c0_27, %c0_28] : memref<1x8x32xf32, #tpu.memory_space<vmem>>, vector<1x8x32xf32>
    %75 = vector.shape_cast %74 : vector<1x8x32xf32> to vector<8x32xf32>
    %76 = vector.shape_cast %73 : vector<8x32xf32> to vector<1x8x32xf32>
    tpu.vector_store %arg4[%c0_26, %c0_27, %c0_28], %76 {strides = array<i32>} : memref<1x8x32xf32, #tpu.memory_space<vmem>>, vector<1x8x32xf32>,
    return
  }
  func.func @transform_0(%arg0: i32) -> (i32, i32, i32) {
    %c0_i32 = arith.constant 0 : i32
    %c0_i32_0 = arith.constant 0 : i32
    %c0_i32_1 = arith.constant 0 : i32
    return %arg0, %c0_i32, %c0_i32_0 : i32, i32, i32
  }
  func.func @transform_1(%arg0: i32) -> (i32, i32) {
    %c0_i32 = arith.constant 0 : i32
    %c0_i32_0 = arith.constant 0 : i32
    %c0_i32_1 = arith.constant 0 : i32
    return %c0_i32, %c0_i32_0 : i32, i32
  }
  func.func @transform_2(%arg0: i32) -> (i32, i32) {
    %c0_i32 = arith.constant 0 : i32
    %c0_i32_0 = arith.constant 0 : i32
    %c0_i32_1 = arith.constant 0 : i32
    return %c0_i32, %c0_i32_0 : i32, i32
  }
  func.func @transform_3(%arg0: i32) -> (i32, i32, i32) {
    %c0_i32 = arith.constant 0 : i32
    %c0_i32_0 = arith.constant 0 : i32
    %c0_i32_1 = arith.constant 0 : i32
    return %arg0, %c0_i32, %c0_i32_0 : i32, i32, i32
  }
}

</mosaic_0001>

<bundles_post_ra>
// kernel: tpu_custom_call.1
= control target key start
LH: loop header
LB: loop body
LE: loop exit
PB: predicated region body
PF: predicated region fallthrough
CT: control target
= control target key end

     0   :  { %8 = vsyncpa [#allocation3], 0  ;;  %s1626_s0 = inlined_call_operand.hbm [shape: f32[2,8,32], index: 0, kind: input, shape index: {}]   ;;  %s1627_s1 = inlined_call_operand.hbm [shape: f32[32,64], index: 1, kind: input, shape index: {}]   ;;  %s1628_s2 = inlined_call_operand.vmem [shape: f32[1,64], index: 2, kind: input, shape index: {}]   ;;  %s1629_s3 = inlined_call_operand.hbm [shape: f32[2,8,32], index: 3, kind: output, shape index: {}]  }
   0x1   :  { %10 = vsyncpa [#allocation3 + $0x1], 0 }
   0x2   :  { %11 = vsyncpa [#allocation6], 0 }
   0x3   :  { %12 = vsyncpa [#allocation4], 0 }
   0x4   :  { %14 = vsyncpa [#allocation4 + $0x1], 0  ;;  %s1395_s12 = smov 0   ;;  %s1397_s13 = smov 0  }
   0x5   :  { %s1399_s14 = smov 0   ;;  %s1401_s15 = smov 0  }
   0x6 LB: > { %s1416_s16 = sadd.s32 4294967295, %s1356_s15   ;;  %s1047_s17 = sadd.s32 4294967294, %s1356_s15   ;;  %s1356_s15 = sphi %s1401_s15, %s1651_s15   ;;  %s1352_s14 = sphi %s1399_s14, %s1650_s14   ;;  %s1348_s13 = sphi %s1397_s13, %s1649_s13   ;;  %s1344_s12 = sphi %s1395_s12, %s1648_s12  }
   0x7   : > { %p40_p0 = scmp.ne.s32.totalorder %s1348_s13, %s1344_s12  ;;  %p1630_p1 = scmp.eq.s32.totalorder %s1416_s16, 0 }
   0x8   : > { %p112_p3 = scmp.eq.s32.totalorder %s1047_s17, 1  ;;  %p1048_p5 = scmp.ge.s32.totalorder %s1356_s15, 1 }
   0x9   : > { %p1425_p4 = por %p1630_p1, %p40_p0  ;;  %p119_p7 = scmp.lt.s32.totalorder %s1356_s15, 3 }
   0xa   : > { %p1430_p6 = por %p112_p3, %p40_p0  ;;  %s1358_s21 = smov [#allocation5]  }
   0xb   : > { %s1634_s18 = scalar_select %p1425_p4, 1, 0 }
   0xc   : > { %s1635_s19 = scalar_select %p1430_p6, 1, 0 }
   0xd   : > { %p1435_p8 = pnand %p1048_p5, %p119_p7  ;;  %s131_s22 = sshll.u32 %s1358_s21, 4  ;;  %s132_s22 = int_to_ptr.vmem [resolvable:$true] %s131_s22 }
   0xe   : > { %s1449_s24 = sadd.s32 1, %s1356_s15   ;;  %s27_s25 = sadd.s32 1, %s1352_s14 }
   0xf   : > { %s1636_s20 = scalar_select %p1435_p8, 1, 0 }
  0x10   : > { %p1155_p9 = pneg %p1435_p8  ;;  %s24_s26 = ssub.s32 %s1356_s15, %s1449_s24 }
  0x11   : > { %s1245_s27 = scalar_lea.vmem %s132_s22, 512  ;;  %p1253_p5 = scmp.lt.s32.totalorder %s132_s22, %s132_s22 }
  0x12   : > { %p1444_p11 = pnand %p1155_p9, %p1630_p1  ;;  %p1246_p13 = scmp.ne.s32.totalorder %s132_s22, %s1245_s27 }
  0x13   : > { %p1254_p7 = scmp.lt.s32.totalorder %s1245_s27, %s1245_s27 }
  0x14   : > { %p1236_p12 = pneg %p1444_p11 }
  0x15   : > { %p1255_p10 = por %p1254_p7, %p1253_p5 }
  0x16   : > { %p1248_p0 = pnand %p1246_p13, %p1236_p12 }
  0x18   : > { %p1249_p3 = pneg %p1248_p0 }
  0x1a   : > { %p1256_p2 = pnand %p1255_p10, %p1249_p3 }
  0x1c   : > { %1259 = shalt.err (!%p1256_p2)
}
  0x1d   : > { %s1359_s28 = smov 128   ;;  %s1360_s29 = smov 8  }
  0x1e   : > { %1158 = dma.hbm_to_vmem [thread:$0]  (!%p1444_p11), %s1627_s1, 512, %s132_s22, [#allocation6], %s1359_s28, %s1359_s28, %s1360_s29  }
  0x1f   : > { %p25_p9 = scmp.eq.s32.totalorder %s24_s26, 0  ;;  %p34_p12 = scmp.ne.s32.totalorder %s1352_s14, %s1348_s13 }
  0x20   : > { %p35_p10 = scmp.eq.s32.totalorder %s1356_s15, 0  ;;  %p1168_p2 = scmp.lt.s32.totalorder %s1356_s15, 2 }
  0x21   : > { %s1466_s5 = scalar_select %p25_p9, %s1352_s14, %s27_s25  }
  0x22   : > { %p36_p13 = por %p35_p10, %p34_p12  ;;  %p1638_p0 = scmp.eq.s32.totalorder %s1416_s16, 1 }
  0x23   : > { %s148_s7 = sand.u32 1, %s1352_s14   ;;  %s1052_s8 = sshll.u32 %s1356_s15, 7 }
  0x24   : > { %p1470_p3 = por %p1638_p0, %p34_p12  ;;  %s1051_s9 = sshll.u32 %s148_s7, 3 }
  0x25   : > { %s1479_s17 = scalar_lea.hbm %s1626_s0, %s1052_s8  ;;  %s152_s21 = scalar_lea.vmem [#allocation2], %s1051_s9 }
  0x26   : > { %s1639_s6 = scalar_select %p1470_p3, 1, 0 }
  0x27   : > { %s159_s22 = sshll.u32 %s152_s21, 4  ;;  %p1481_p11 = pnand %p1168_p2, %p36_p13  ;;  %s160_s22 = int_to_ptr.vmem [resolvable:$true] %s159_s22 }
  0x28   : > { %s149_s25 = scalar_lea.sflag [#allocation3], %s148_s7  ;;  %s1260_s26 = scalar_lea.hbm %s1479_s17, 128 }
  0x29   : > { %p1261_p5 = scmp.ne.s32.totalorder %s1479_s17, %s1260_s26  ;;  %p1262_p7 = pneg %p1481_p11 }
  0x2a   : > { %s1265_s29 = scalar_lea.hbm %s1626_s0, 256  ;;  %p1266_p10 = scmp.lt.s32.totalorder %s1479_s17, %s1626_s0 }
  0x2b   : > { %p1263_p9 = pnand %p1262_p7, %p1261_p5  ;;  %p1267_p2 = scmp.lt.s32.totalorder %s1265_s29, %s1260_s26 }
  0x2d   : > { %p1264_p12 = pneg %p1263_p9  ;;  %p1268_p13 = por %p1267_p2, %p1266_p10 }
  0x2f   : > { %p1269_p0 = pnand %p1268_p13, %p1264_p12 }
  0x31   : > { %1272 = shalt.err (!%p1269_p0)
}
  0x32   : > { %s1273_s8 = scalar_lea.vmem %s160_s22, 128  ;;  %s1361_s7 = smov [#allocation2]  }
  0x33   : > { %p1274_p1 = scmp.ne.s32.totalorder %s160_s22, %s1273_s8  ;;  %s1278_s9 = sshll.u32 %s1361_s7, 4  ;;  %s1279_s9 = int_to_ptr.vmem [resolvable:$false] %s1278_s9 }
  0x34   : > { %s1280_s10 = scalar_lea.vmem %s1279_s9, 256  ;;  %p1281_p5 = scmp.lt.s32.totalorder %s160_s22, %s1279_s9 }
  0x35   : > { %p1276_p6 = pnand %p1274_p1, %p1262_p7  ;;  %p1282_p9 = scmp.lt.s32.totalorder %s1280_s10, %s1273_s8 }
  0x37   : > { %p1277_p3 = pneg %p1276_p6  ;;  %p1283_p4 = por %p1282_p9, %p1281_p5 }
  0x39   : > { %p1284_p8 = pnand %p1283_p4, %p1277_p3 }
  0x3b   : > { %1287 = shalt.err (!%p1284_p8)
}
  0x3c   : > { %1162 = dma.hbm_to_vmem [thread:$0]  (!%p1481_p11), %s1479_s17, 128, %s160_s22, %s149_s25  }
  0x3d   : > { %p1641_p12 = scmp.ne.s32.totalorder %s1636_s20, 0 }
  0x3e   : > { %s1502_s11 = sand.u32 (!%p1641_p12), 1, %s1348_s13   ;;  %p1642_p1 = scmp.ne.s32.totalorder (!%p1641_p12), %s1634_s18, 0 }
  0x3f   : > { %168 = sbr.rel (%p1641_p12) target bundleno = 1277 (0x4fd), region = 32  ;;  %s1054_s21 = sshll.u32 (!%p1641_p12), %s1502_s11, 3 }
  0x40   : > { %s171_s26 = scalar_lea.sflag (!%p1641_p12), [#allocation3], %s1502_s11  ;;  %s174_s27 = scalar_lea.vmem (!%p1641_p12), [#allocation2], %s1054_s21 }
  0x44   : > { %1331 = dma.done.wait (%p1642_p1), %s171_s26, 128  }
  0x45   : > { %1333 = vsyncadd (%p1642_p1), %s171_s26, 4294967168  ;;  %p1643_p4 = scmp.eq.s32.totalorder %s1416_s16, 0 }
  0x47   : > { %1335 = dma.done.wait (%p1643_p4), [#allocation6], 512   ;;  %p1644_p6 = pmov %p1643_p4 }
  0x48   : > { %v1362_v0 = vmov 0.0   ;;  %vm1363_vm0 = vmmov 0   ;;  %v205_v1 = vld [vmem:[#allocation5 + $0x18] sm:$0xff]  ;;  %v204_v2 = vld [vmem:[#allocation5 + $0x10] sm:$0xff]  ;;  %v203_v3 = vld [vmem:[#allocation5 + $0x8] sm:$0xff]  ;;  %vm213_vm1 = vcmask 261120  }
  0x49   : > { %1337 = vsyncadd (%p1644_p6), [#allocation6], 4294966784  ;;  %1096 = vmatprep.subr.mxu0 %v1362_v0  ;;  %1104 = vmatprep.mubr.msk.f32.mxu0 %vm1363_vm0, %v1362_v0  ;;  %v202_v4 = vld [vmem:[#allocation5] sm:$0xff]  ;;  %v201_v5 = vld [vmem:[%s174_s27] sm:$0xff]  ;;  %vm287_vm2 = vcmask 64512   ;;  %s1364_s17 = smov 104  }
  0x4a   : > { %1107 = vmatprep.subr.mxu1 %v1362_v0  ;;  %1109 = vmatprep.mubr.msk.f32.mxu1 %vm1363_vm0, %v1362_v0  ;;  %v1057_v6 = vld [vmem:[%s1628_s2] ss:$0 sm:$0xff]  ;;  %s1365_s22 = smov 120   ;;  %s1366_s23 = smov 112   ;;  %vm948_vm3 = vcmask 130048   ;;  %vm950_vm4 = vcmask 195584  }
  0x4b   : > { %1097 = vmatpush3.msra.mxu0 %v205_v1  ;;  %s1367_s25 = smov 88   ;;  %s1368_s28 = smov 96  }
  0x4c   : > { %1098 = vmatprep.subr.mxu0 %v1362_v0  ;;  %s1369_s29 = smov 72   ;;  %s1370_s30 = smov 80  }
  0x4d   : > { %1099 = vmatpush3.msra.mxu0 %v204_v2  ;;  %s1371_s4 = smov 8   ;;  %s1372_s8 = smov 16  }
  0x4e   : > { %1100 = vmatprep.subr.mxu0 %v1362_v0  ;;  %s1373_s7 = smov 24   ;;  %s1072_s9 = sshll.u32 %s1416_s16, 7 }
  0x4f   : > { %1101 = vmatpush3.msra.mxu0 %v203_v3  ;;  %s200_s10 = scalar_lea.vmem [#allocation7], %s1054_s21  ;;  %s1588_s20 = scalar_lea.hbm %s1629_s3, %s1072_s9 }
  0x50   : > { %1102 = vmatprep.subr.mxu0 %v1362_v0  ;;  %s967_s26 = sshll.u32 %s200_s10, 4  ;;  %p1645_p3 = scmp.ne.s32.totalorder %s1639_s6, 0  ;;  %s968_s26 = int_to_ptr.vmem [resolvable:$true] %s967_s26 }
  0x51   : > { %1103 = vmatpush3.msra.mxu0 %v202_v4  ;;  %s1374_s16 = smov [#allocation7]  }
  0x52   : > { %1105 = vmatmul.mubr.msk.f32.vlgmr.msra.gmra.mxu0 %vm213_vm1, %v201_v5  ;;  %1117 = vmatprep.subr.mxu0 %v1362_v0  ;;  %s1292_s21 = sshll.u32 %s1374_s16, 4  ;;  %s1293_s21 = int_to_ptr.vmem [resolvable:$false] %s1292_s21 }
  0x53   : > { %1119 = vmatprep.mubr.msk.f32.mxu0 %vm1363_vm0, %v1362_v0  ;;  %p1295_p10 = scmp.lt.s32.totalorder %s968_s26, %s1293_s21 }
 0x112   : > { %v283_v7 = vpop.f32.mrf.mxu0 }
 0x113   : > { %v1532_v8 = vadd.f32 %v1057_v6, %v283_v7 }
 0x114   : > { %v1106_v9 = vpop.f32.mrf.mxu0 }
 0x115   : > { %773 = vrot.lane.b32.xlu1 %v1532_v8, %s1364_s17  ;;  %449 = vrot.lane.b32.xlu0 %v1532_v8, %s1365_s22  ;;  %s954_s17 = scalar_lea.sflag [#allocation4], %s1502_s11  ;;  %s1288_s22 = scalar_lea.vmem %s968_s26, 128 }
 0x116   : > { %1108 = vmatpush3.xpose.msk.msra.mxu1 %vm287_vm2, %v1532_v8  ;;  %p1289_p8 = scmp.ne.s32.totalorder %s968_s26, %s1288_s22 }
 0x117   : > { %1112 = vmatprep.subr.mxu1 %v1362_v0 }
 0x118   : > { %p1290_p11 = pnand %p1289_p8, %p1645_p3 }
 0x119   : > { %1110 = vmatmul.mubr.msk.f32.vlgmr.msra.gmra.mxu1 %vm287_vm2, %v1532_v8  ;;  %611 = vrot.lane.b32.xlu0 %v1532_v8, %s1366_s23  ;;  %s1294_s23 = scalar_lea.vmem %s1293_s21, 256 }
 0x11a   : > { %1114 = vmatprep.mubr.msk.f32.mxu1 %vm1363_vm0, %v1362_v0  ;;  %p1291_p7 = pneg %p1290_p11  ;;  %p1296_p2 = scmp.lt.s32.totalorder %s1294_s23, %s1288_s22 }
 0x11c   : > { %p1297_p13 = por %p1296_p2, %p1295_p10 }
 0x11e   : > { %p1298_p0 = pnand %p1297_p13, %p1291_p7 }
 0x187   : > { %v450_v10 = vpop.permute.xlu0 %449  ;;  %v774_v12 = vpop.permute.xlu1 %773 }
 0x188   : > { %1118 = vmatpush3.xpose.msk.msra.mxu0 %vm287_vm2, %v450_v10 }
 0x189   : > { %1127 = vmatprep.subr.mxu0 %v1362_v0 }
 0x18b   : > { %1120 = vmatmul.mubr.msk.f32.vlgmr.msra.gmra.mxu0 %vm287_vm2, %v450_v10  ;;  %v612_v11 = vpop.permute.xlu0 %611 }
 0x18c   : > { %1128 = vmatpush3.xpose.msk.msra.mxu0 %vm287_vm2, %v612_v11  ;;  %1129 = vmatprep.mubr.msk.f32.mxu0 %vm1363_vm0, %v1362_v0 }
 0x18d   : > { %1137 = vmatprep.subr.mxu0 %v1362_v0 }
 0x18f   : > { %1130 = vmatmul.mubr.msk.f32.vlgmr.msra.gmra.mxu0 %vm287_vm2, %v612_v11 }
 0x190   : > { %1138 = vmatpush3.xpose.msk.msra.mxu0 %vm287_vm2, %v774_v12  ;;  %1139 = vmatprep.mubr.msk.f32.mxu0 %vm1363_vm0, %v1362_v0 }
 0x193   : > { %1140 = vmatmul.mubr.msk.f32.vlgmr.msra.gmra.mxu0 %vm287_vm2, %v774_v12 }
 0x1d9   : > { %v357_v13 = vpop.f32.mrf.mxu1 }
 0x1da   : > { %v361_v14 = vsel %vm287_vm2, %v357_v13, -inf }
 0x1db   : > { %362 = vmax.xlane.f32.xlu1 %v361_v14  ;;  %v1111_v15 = vpop.f32.mrf.mxu1 }
 0x24b   : > { %v519_v16 = vpop.f32.mrf.mxu0 }
 0x24c   : > { %v523_v17 = vsel %vm287_vm2, %v519_v16, -inf }
 0x24d   : > { %524 = vmax.xlane.f32.xlu0 %v523_v17  ;;  %v1121_v18 = vpop.f32.mrf.mxu0 }
 0x24f   : > { %v681_v19 = vpop.f32.mrf.mxu0 }
 0x250   : > { %v685_v20 = vsel %vm287_vm2, %v681_v19, -inf }
 0x251   : > { %686 = vmax.xlane.f32.xlu0 %v685_v20  ;;  %v1131_v21 = vpop.f32.mrf.mxu0 }
 0x253   : > { %v843_v22 = vpop.f32.mrf.mxu0 }
 0x254   : > { %v847_v23 = vsel %vm287_vm2, %v843_v22, -inf }
 0x255   : > { %848 = vmax.xlane.f32.xlu1 %v847_v23  ;;  %v1141_v24 = vpop.f32.mrf.mxu0 }
 0x264   : > { %v363_v25 = vpop.xlane.xlu1 %362 }
 0x265   : > { %v364_v26 = vsub.f32 %v357_v13, %v363_v25 }
 0x267   : > { %v365_v27 = vmul.f32 1.442695, %v364_v26 }
 0x269   : > { %1218 = vpow2.f32 %v365_v27 }
 0x276   : > { %v1219_v28 = vpop.eup %1218 }
 0x277   : > { %v367_v29 = vsel %vm287_vm2, %v1219_v28, 0.0 }
 0x278   : > { %368 = vadd.xlane.f32.xlu0 %v367_v29 }
 0x2d6   : > { %v525_v30 = vpop.xlane.xlu0 %524 }
 0x2d7   : > { %v526_v31 = vsub.f32 %v519_v16, %v525_v30 }
 0x2d9   : > { %v527_v32 = vmul.f32 1.442695, %v526_v31 }
 0x2da   : > { %v687_v33 = vpop.xlane.xlu0 %686 }
 0x2db   : > { %1220 = vpow2.f32 %v527_v32  ;;  %v688_v34 = vsub.f32 %v681_v19, %v687_v33 }
 0x2dd   : > { %v689_v35 = vmul.f32 1.442695, %v688_v34 }
 0x2de   : > { %v849_v40 = vpop.xlane.xlu1 %848 }
 0x2df   : > { %1222 = vpow2.f32 %v689_v35  ;;  %v850_v41 = vsub.f32 %v843_v22, %v849_v40 }
 0x2e1   : > { %v851_v42 = vmul.f32 1.442695, %v850_v41 }
 0x2e3   : > { %1224 = vpow2.f32 %v851_v42 }
 0x2e8   : > { %v1221_v36 = vpop.eup %1220 }
 0x2e9   : > { %v529_v37 = vsel %vm287_vm2, %v1221_v36, 0.0 }
 0x2ea   : > { %530 = vadd.xlane.f32.xlu1 %v529_v37 }
 0x2ec   : > { %v1223_v38 = vpop.eup %1222 }
 0x2ed   : > { %v691_v39 = vsel %vm287_vm2, %v1223_v38, 0.0 }
 0x2ee   : > { %692 = vadd.xlane.f32.xlu0 %v691_v39 }
 0x2f0   : > { %v1225_v43 = vpop.eup %1224 }
 0x2f1   : > { %v853_v44 = vsel %vm287_vm2, %v1225_v43, 0.0 }
 0x2fb   : > { %535 = vrot.lane.b32.xlu1 %v1532_v8, %s1367_s25 }
 0x301   : > { %v369_v45 = vpop.xlane.xlu0 %368 }
 0x302   : > { %v370_v46 = vmul.f32 5.656854, %v369_v45 }
 0x304   : > { %373 = vrot.lane.b32.xlu0 %v1532_v8, %s1368_s28  ;;  %1226 = vrcp.f32 %v370_v46 }
 0x308   : > { %859 = vrot.lane.b32.xlu0 %v1532_v8, %s1369_s29 }
 0x311   : > { %v1227_v50 = vpop.eup %1226 }
 0x312   : > { %v372_v52 = vmul.f32 %v1227_v50, %v1219_v28 }
 0x31f   : > { %854 = vadd.xlane.f32.xlu1 %v853_v44 }
 0x330   : > { %697 = vrot.lane.b32.xlu1 %v1532_v8, %s1370_s30 }
 0x373   : > { %v531_v47 = vpop.xlane.xlu1 %530 }
 0x374   : > { %v532_v48 = vmul.f32 5.656854, %v531_v47 }
 0x376   : > { %1228 = vrcp.f32 %v532_v48 }
 0x377   : > { %v693_v49 = vpop.xlane.xlu0 %692  ;;  %v536_v53 = vpop.permute.xlu1 %535 }
 0x378   : > { %v694_v56 = vmul.f32 5.656854, %v693_v49 }
 0x37a   : > { %1230 = vrcp.f32 %v694_v56 }
 0x37b   : > { %v374_v51 = vpop.permute.xlu0 %373 }
 0x37c   : > { %1113 = vmatpush3.msra.mxu1 %v374_v51 }
 0x37d   : > { %1115 = vmatmul.mubr.msk.f32.vlgmr.msra.gmra.mxu1 %vm287_vm2, %v372_v52  ;;  %1122 = vmatprep.subr.mxu1 %v1362_v0 }
 0x37e   : > { %1123 = vmatpush3.msra.mxu1 %v536_v53  ;;  %1124 = vmatprep.mubr.msk.f32.mxu1 %vm1363_vm0, %v1362_v0 }
 0x37f   : > { %1132 = vmatprep.subr.mxu1 %v1362_v0  ;;  %v860_v62 = vpop.permute.xlu0 %859 }
 0x383   : > { %v1229_v54 = vpop.eup %1228 }
 0x384   : > { %v534_v55 = vmul.f32 %v1229_v54, %v1221_v36 }
 0x386   : > { %1125 = vmatmul.mubr.msk.f32.vlgmr.msra.gmra.mxu1 %vm287_vm2, %v534_v55 }
 0x387   : > { %1134 = vmatprep.mubr.msk.f32.mxu1 %vm1363_vm0, %v1362_v0  ;;  %v1231_v58 = vpop.eup %1230 }
 0x388   : > { %v696_v61 = vmul.f32 %v1231_v58, %v1223_v38 }
 0x3a8   : > { %v855_v57 = vpop.xlane.xlu1 %854 }
 0x3a9   : > { %v856_v59 = vmul.f32 5.656854, %v855_v57 }
 0x3ab   : > { %1232 = vrcp.f32 %v856_v59 }
 0x3ac   : > { %v698_v60 = vpop.permute.xlu1 %697 }
 0x3ad   : > { %1133 = vmatpush3.msra.mxu1 %v698_v60 }
 0x3ae   : > { %1135 = vmatmul.mubr.msk.f32.vlgmr.msra.gmra.mxu1 %vm287_vm2, %v696_v61  ;;  %1142 = vmatprep.subr.mxu1 %v1362_v0 }
 0x3af   : > { %1143 = vmatpush3.msra.mxu1 %v860_v62  ;;  %1144 = vmatprep.mubr.msk.f32.mxu1 %vm1363_vm0, %v1362_v0 }
 0x3b8   : > { %v1233_v63 = vpop.eup %1232 }
 0x3b9   : > { %v858_v1 = vmul.f32 %v1233_v63, %v1225_v43 }
 0x3bb   : > { %1145 = vmatmul.mubr.msk.f32.vlgmr.msra.gmra.mxu1 %vm287_vm2, %v858_v1 }
 0x43d   : > { %v445_v2 = vpop.f32.mrf.mxu1 }
 0x43f   : > { %v1116_v3 = vpop.f32.mrf.mxu1 }
 0x446   : > { %v607_v4 = vpop.f32.mrf.mxu1 }
 0x447   : > { %936 = vrot.lane.b32.xlu1 %v607_v4, %s1371_s4 }
 0x448   : > { %v1126_v5 = vpop.f32.mrf.mxu1 }
 0x46e   : > { %v769_v6 = vpop.f32.mrf.mxu1 }
 0x46f   : > { %940 = vrot.lane.b32.xlu0 %v769_v6, %s1372_s8 }
 0x470   : > { %v1136_v7 = vpop.f32.mrf.mxu1 }
 0x47b   : > { %v931_v8 = vpop.f32.mrf.mxu1 }
 0x47c   : > { %944 = vrot.lane.b32.xlu1 %v931_v8, %s1373_s7 }
 0x47d   : > { %v1146_v0 = vpop.f32.mrf.mxu1 }
 0x4b9   : > { %v937_v9 = vpop.permute.xlu1 %936 }
 0x4ba   : > { %v947_v11 = vsel %vm287_vm2, %v445_v2, %v937_v9 }
 0x4e1   : > { %v941_v10 = vpop.permute.xlu0 %940 }
 0x4e2   : > { %v949_v12 = vsel %vm948_vm3, %v947_v11, %v941_v10 }
 0x4ee   : > { %v945_v13 = vpop.permute.xlu1 %944 }
 0x4ef   : > { %v951_v14 = vsel %vm950_vm4, %v949_v12, %v945_v13 }
 0x4f0   : > { %952 = vst.msk [vmem:[%s200_s10] sm:$0xff] %vm213_vm1, %v951_v14 }
 0x4f1   : > { %1301 = shalt.err (!%p1298_p0)
}
 0x4f2   : > { %s1302_s25 = scalar_lea.hbm %s1588_s20, 128  ;;  %s1306_s29 = scalar_lea.hbm %s1629_s3, 256 }
 0x4f3   : > { %p1303_p5 = scmp.ne.s32.totalorder %s1588_s20, %s1302_s25  ;;  %p1307_p1 = scmp.lt.s32.totalorder %s1588_s20, %s1629_s3 }
 0x4f4   : > { %p1308_p4 = scmp.lt.s32.totalorder %s1306_s29, %s1302_s25 }
 0x4f5   : > { %p1304_p9 = pnand %p1303_p5, %p1645_p3 }
 0x4f6   : > { %p1309_p6 = por %p1308_p4, %p1307_p1 }
 0x4f7   : > { %p1305_p12 = pneg %p1304_p9 }
 0x4f9   : > { %p1310_p8 = pnand %p1309_p6, %p1305_p12 }
 0x4fb   : > { %1313 = shalt.err (!%p1310_p8)
}
 0x4fc   : > { %1153 = dma.vmem_to_hbm [thread:$0]  (%p1645_p3), %s968_s26, 128, %s1588_s20, %s954_s17  }
 0x4fd PF: > { %s979_s8 = sand.u32 1, %s1344_s12   ;;  %p1646_p11 = scmp.ne.s32.totalorder %s1635_s19, 0 }
 0x4fe   : > { %p1647_p7 = scmp.ge.s32.totalorder %s1356_s15, 2  ;;  %s980_s7 = scalar_lea.sflag [#allocation4], %s979_s8 }
 0x500   : > { %p1164_p10 = pnand %p1647_p7, %p1646_p11 }
 0x502   : > { %p1165_p2 = pneg %p1164_p10 }
 0x504   : > { %1339 = dma.done.wait (%p1165_p2), %s980_s7, 128  }
 0x505   : > { %1341 = vsyncadd (%p1165_p2), %s980_s7, 4294967168  ;;  %p17_p13 = scmp.ge.s32.totalorder %s1449_s24, 4   ;;  %s1648_s12 = smov %s1348_s13 }
 0x506   : > { %s1649_s13 = smov %s1352_s14  ;;  %s1650_s14 = smov %s1466_s5 }
 0x507   : > { %s1651_s15 = smov %s1449_s24  ;;  %19 = sbr.rel (!%p17_p13) target bundleno = 6 (0x6), region = 81 }
 0x50c   :  { %985 = vsyncpa [#allocation3], 1 }
 0x50d   :  { %987 = vsyncpa [#allocation3 + $0x1], 1 }
 0x50e   :  { %988 = vsyncpa [#allocation6], 1 }
 0x50f   :  { %989 = vsyncpa [#allocation4], 1 }
 0x510   :  { %991 = vsyncpa [#allocation4 + $0x1], 1 }

</bundles_post_ra>
